<compile_context>
chip_gen: v7x
topology: tpu7x:2x2x1
jax: 0.10.0
libtpu: 0.0.40
codegen_flags: <defaults>
</compile_context>

<pallas_src>
import jax
import jax.numpy as jnp
from jax import lax
from jax.experimental import pallas as pl
from jax.experimental.pallas import tpu as pltpu


_T_TILE = 32      # enc rows per joint tile   (matmul M = _T_TILE * _U_TILE)
_U_TILE = 32      # dec rows per joint tile
_V_TILE = 512     # vocab tile (lane-dense multiple of 128, fills MXU N)
_CHUNK_T = 8      # enc rows per tanh chunk (bounds f32 live temporaries)


def _round_up(x, m):
    return (x + m - 1) // m * m


def _vmem_capacity_bytes():
    """Per-core VMEM capacity; conservative fallback if the query fails."""
    try:
        return int(pltpu.get_tpu_info().vmem_capacity_bytes)
    except Exception:
        return 64 * 1024 * 1024   # v7x per-core VMEM (most restrictive)


# ----------------------------------------------------------------------------
# Pallas kernel 1: factored first Linear  (x @ W + b), cheap (T+U)-sized work.
# ----------------------------------------------------------------------------
def _proj_kernel(x_ref, w_ref, b_ref, o_ref):
    # (tL, Din) @ (Din, H) + (1, H) -> (tL, H), f32 accumulation on the MXU.
    h = jnp.dot(x_ref[0], w_ref[...], preferred_element_type=jnp.float32)
    o_ref[0] = (h + b_ref[...]).astype(o_ref.dtype)


def _project(x, w, b, out_dtype):
    """x (B, L, Din) @ w (Din, H) + b (1, H) -> (B, L, H).  L is tiled so a
    long sequence never needs a full-sequence VMEM slab (v7x budget)."""
    B, L, Din = x.shape
    H = w.shape[1]
    assert L % 8 == 0, L
    tL = next(t for t in (512, 256, 128, 64, 32, 16, 8) if L % t == 0)
    return pl.pallas_call(
        _proj_kernel,
        out_shape=jax.ShapeDtypeStruct((B, L, H), out_dtype),
        grid=(B, L // tL),
        in_specs=[
            pl.BlockSpec((1, tL, Din), lambda b, l: (b, l, 0)),
            pl.BlockSpec((Din, H), lambda b, l: (0, 0)),
            pl.BlockSpec((1, H), lambda b, l: (0, 0)),
        ],
        out_specs=pl.BlockSpec((1, tL, H), lambda b, l: (b, l, 0)),
        compiler_params=pltpu.CompilerParams(
            dimension_semantics=("parallel", "parallel")),
    )(x, w, b)


# ----------------------------------------------------------------------------
# Pallas kernel 2: joint combine — tanh(enc_h[t] + dec_h[u]) @ W2 + b2,
# tiled over (T, B, U, V) with a tanh cache reused across the V axis and a
# (preferably) VMEM-resident W2.
# ----------------------------------------------------------------------------
def _make_joint_combine_kernel(tT, tU, tV, chunk_t, w2_resident):
    def kernel(enc_h_ref, dec_h_ref, w2_ref, b2_ref, o_ref, h_ref):
        v = pl.program_id(3)

        # h (tanh cache) is independent of the vocab tile: recompute it only
        # when entering a new (t-tile, b, u-tile).  NOTE: this is correct ONLY
        # because V is the innermost, sequentially iterated ("arbitrary") grid
        # axis — do not reorder the grid or mark V "parallel".
        @pl.when(v == 0)
        def _():
            d = dec_h_ref[0]                                     # (tU, H) f32

            def chunk(c, carry):
                r0 = pl.multiple_of(c * chunk_t, chunk_t)
                e = enc_h_ref[0, pl.ds(r0, chunk_t), :]          # (chunk_t, H)
                h = jnp.tanh(e[:, None, :] + d[None, :, :])      # f32
                s0 = pl.multiple_of(c * (chunk_t * tU), chunk_t * tU)
                h_ref[pl.ds(s0, chunk_t * tU), :] = (
                    h.reshape(chunk_t * tU, h.shape[-1]).astype(h_ref.dtype))
                return carry

            lax.fori_loop(0, tT // chunk_t, chunk, 0, unroll=True)

        if w2_resident:
            # W2/b2 live fully in VMEM (DMA'd once); slice the current V tile.
            v0 = pl.multiple_of(v * tV, tV)
            w2_t = w2_ref[:, pl.ds(v0, tV)]                      # (H, tV)
            b2_t = b2_ref[:, pl.ds(v0, tV)]                      # (1, tV)
        else:
            w2_t = w2_ref[...]
            b2_t = b2_ref[...]

        logits = jnp.dot(h_ref[...], w2_t,
                         preferred_element_type=jnp.float32)    # (tT*tU, tV)
        logits = logits + b2_t
        o_ref[0] = logits.reshape(tT, tU, tV).astype(o_ref.dtype)

    return kernel


# ----------------------------------------------------------------------------
# One-time weight preparation (outside the per-call hot path).
# ----------------------------------------------------------------------------
def prepare_joint_weights(w1, b1, w2, b2, enc_dim, compute_dtype=jnp.bfloat16):
    """Split W1 into encoder/decoder halves, pre-transpose to (in, out), pad the
    vocab axis to a multiple of _V_TILE (lane-dense, fixed large tV) and cast
    matmul operands to the compute dtype (bf16 default, f32 accumulation)."""
    inner, C = w1.shape
    vocab = w2.shape[0]
    dec_dim = C - enc_dim
    v_pad = _round_up(vocab, _V_TILE)

    w1_enc = w1[:, :enc_dim].T.astype(compute_dtype)       # (De, H)
    w1_dec = w1[:, enc_dim:].T.astype(compute_dtype)       # (Dd, H)
    b1_2d = b1.reshape(1, inner).astype(jnp.float32)       # folded into enc_h
    zero_b = jnp.zeros((1, inner), jnp.float32)             # dec_h gets no bias

    w2_t = w2.T.astype(compute_dtype)                        # (H, V)
    b2_2d = b2.reshape(1, vocab).astype(jnp.float32)
    if v_pad != vocab:
        w2_t = jnp.pad(w2_t, ((0, 0), (0, v_pad - vocab)))
        b2_2d = jnp.pad(b2_2d, ((0, 0), (0, v_pad - vocab)))

    return dict(w1_enc=w1_enc, w1_dec=w1_dec, b1=b1_2d, zero_b=zero_b,
                w2=w2_t, b2=b2_2d, vocab=vocab, enc_dim=enc_dim,
                dec_dim=dec_dim, inner=inner, compute_dtype=compute_dtype)


def joint_net_pallas(enc_state, dec_state, jw, out_dtype=jnp.float32):
    """enc_state (B,T,De), dec_state (B,U,Dd) -> PADDED logits (B,Tp,Up,Vp).

    Padding is NOT trimmed here (the pad-then-slice would re-copy the largest
    tensor and roughly double HBM traffic of a writeback-bound kernel).  Valid
    extents are (T, U, jw['vocab']); padded T/U rows contain
    tanh(b1 + dec_h)@W2+b2 garbage and padded vocab lanes are exactly 0 — the
    consumer (loss / softmax) must mask them."""
    B, T, De = enc_state.shape
    _, U, Dd = dec_state.shape
    H = jw["inner"]
    Vp = jw["w2"].shape[1]
    cdt = jw["compute_dtype"]
    assert De == jw["enc_dim"] and Dd == jw["dec_dim"]
    assert Vp % _V_TILE == 0

    tT, tU, tV, chunk_t = _T_TILE, _U_TILE, _V_TILE, _CHUNK_T
    Tp = _round_up(T, tT)
    Up = _round_up(U, tU)

    enc = enc_state.astype(cdt)
    dec = dec_state.astype(cdt)
    if Tp != T:
        enc = jnp.pad(enc, ((0, 0), (0, Tp - T), (0, 0)))
    if Up != U:
        dec = jnp.pad(dec, ((0, 0), (0, Up - U), (0, 0)))

    # Factored first Linear, outputs kept in f32 (tiny vs. the logits, and it
    # avoids bf16 double-rounding before the tanh):
    #   enc_h = enc @ W1e + b1 ; dec_h = dec @ W1d (bias folded into enc_h).
    enc_h = _project(enc, jw["w1_enc"], jw["b1"], jnp.float32)      # (B,Tp,H)
    dec_h = _project(dec, jw["w1_dec"], jw["zero_b"], jnp.float32)  # (B,Up,H)

    # ---- Per-generation VMEM budget: can W2/b2 stay resident? --------------
    cap = _vmem_capacity_bytes()
    cdt_sz = jnp.dtype(cdt).itemsize
    out_sz = jnp.dtype(out_dtype).itemsize
    fixed = (2 * (tT + tU) * H * 4              # enc_h/dec_h blocks (dbl-buf)
             + 2 * tT * tU * tV * out_sz        # output blocks (dbl-buf)
             + tT * tU * H * cdt_sz             # tanh VMEM cache
             + 2 * chunk_t * tU * H * 4)        # tanh f32 temporaries (slack)
    w2_res_bytes = 2 * (H * Vp * cdt_sz + Vp * 4)   # W2+b2, assume dbl-buffered
    w2_resident = fixed + w2_res_bytes <= int(0.70 * cap)
    vmem_need = fixed + (w2_res_bytes if w2_resident
                         else 2 * (H * tV * cdt_sz + tV * 4))
    vmem_limit = int(min(max(32 << 20, int(vmem_need * 1.5) + (4 << 20)),
                         int(0.85 * cap)))

    # Largest "parallel" axis first so v7x's two TensorCores split evenly even
    # when B == 1; V stays innermost ("arbitrary") for the tanh-cache reuse.
    grid = (Tp // tT, B, Up // tU, Vp // tV)
    kernel = _make_joint_combine_kernel(tT, tU, tV, chunk_t, w2_resident)

    if w2_resident:
        w2_spec = pl.BlockSpec((H, Vp), lambda i, b, j, v: (0, 0))
        b2_spec = pl.BlockSpec((1, Vp), lambda i, b, j, v: (0, 0))
        w2_hbm_bytes = H * Vp * cdt_sz + Vp * 4
    else:
        w2_spec = pl.BlockSpec((H, tV), lambda i, b, j, v: (0, v))
        b2_spec = pl.BlockSpec((1, tV), lambda i, b, j, v: (0, v))
        w2_hbm_bytes = (H * Vp * cdt_sz + Vp * 4) * B * (Tp // tT) * (Up // tU)

    cost = pl.CostEstimate(
        flops=2 * B * Tp * Up * H * Vp,
        transcendentals=B * Tp * Up * H,
        bytes_accessed=(B * Tp * Up * Vp * out_sz        # logits writeback
                        + B * (Tp + Up) * H * 4          # enc_h / dec_h reads
                        + w2_hbm_bytes))

    logits = pl.pallas_call(
        kernel,
        out_shape=jax.ShapeDtypeStruct((B, Tp, Up, Vp), out_dtype),
        grid=grid,
        in_specs=[
            pl.BlockSpec((1, tT, H), lambda i, b, j, v: (b, i, 0)),
            pl.BlockSpec((1, tU, H), lambda i, b, j, v: (b, j, 0)),
            w2_spec,
            b2_spec,
        ],
        out_specs=pl.BlockSpec((1, tT, tU, tV),
                               lambda i, b, j, v: (b, i, j, v)),
        scratch_shapes=[pltpu.VMEM((tT * tU, H), cdt)],
        compiler_params=pltpu.CompilerParams(
            dimension_semantics=("parallel", "parallel", "parallel",
                                 "arbitrary"),
            vmem_limit_bytes=vmem_limit),
        cost_estimate=cost,
    )(enc_h, dec_h, jw["w2"], jw["b2"])

    return logits


# ----------------------------------------------------------------------------
# Transducer forward (plain-JAX glue around the Pallas joint kernels).
# ----------------------------------------------------------------------------
def transducer_forward(params, inputs, targets):
    # TODO(synk): build_encoder(config) is undefined in the source; stubbed as a
    # deterministic linear+tanh producing enc_state (B, T, enc_dim).
    enc_state = jnp.tanh(inputs @ params["w_enc"])

    # F.pad(targets, pad=[1, 0], value=0): prepend the blank token.
    concat_targets = jnp.pad(targets, ((0, 0), (1, 0)), constant_values=0)

    # TODO(synk): build_decoder(config) is undefined; stubbed as an embedding
    # lookup producing dec_state (B, U+1, dec_dim).
    dec_state = params["embedding"][concat_targets]

    # JointNet — the Pallas hot path.  Returned logits are PADDED
    # (B, Tp, Up, Vp); valid extents are (T, U+1, vocab) and the consumer
    # (RNNT loss / softmax) must mask padded rows/lanes.
    logits = joint_net_pallas(enc_state, dec_state, params["joint_prepped"],
                              out_dtype=jnp.float32)

    # TODO(synk): RNNTLoss (warp-transducer forward-backward DP) is an external
    # module with no clean Pallas equivalent here; returning the padded joint
    # logits instead of the scalar loss.
    return logits


# ----------------------------------------------------------------------------
# Pure-JAX reference for the JointNet (mirrors the PyTorch semantics).
# ----------------------------------------------------------------------------
def joint_net_ref(enc_state, dec_state, w1, b1, w2, b2):
    B, T, De = enc_state.shape
    _, U, Dd = dec_state.shape
    enc_b = jnp.broadcast_to(enc_state[:, :, None, :], (B, T, U, De))
    dec_b = jnp.broadcast_to(dec_state[:, None, :, :], (B, T, U, Dd))
    cat = jnp.concatenate([enc_b, dec_b], axis=-1)
    h = jnp.tanh(cat @ w1.T + b1)
    return h @ w2.T + b2


if __name__ == "__main__":
    key = jax.random.PRNGKey(0)

    # Small, TPU-friendly shapes consistent with the module
    # (config.joint.input_size = enc_dim + dec_dim, config.joint.inner_size,
    #  config.vocab_size).  U = U_t + 1 after the prepended blank; T=40/U=21
    # exercise the T/U padding paths, vocab=600 pads to 1024 and exercises the
    # V tiling (2 V tiles) plus the padded-lane path.
    B, T, feat = 2, 40, 16
    U_t = 20
    enc_dim, dec_dim = 64, 64
    inner = 128
    vocab = 600

    ks = jax.random.split(key, 8)
    inputs = jax.random.normal(ks[0], (B, T, feat), dtype=jnp.float32)
    targets = jax.random.randint(ks[1], (B, U_t), 1, vocab, dtype=jnp.int32)

    params = {
        "w_enc": jax.random.normal(ks[2], (feat, enc_dim), jnp.float32) * 0.1,
        "embedding": jax.random.normal(ks[3], (vocab, dec_dim), jnp.float32) * 0.1,
        "joint_w1": jax.random.normal(ks[4], (inner, enc_dim + dec_dim), jnp.float32) * 0.1,
        "joint_b1": jax.random.normal(ks[5], (inner,), jnp.float32) * 0.1,
        "joint_w2": jax.random.normal(ks[6], (vocab, inner), jnp.float32) * 0.1,
        "joint_b2": jax.random.normal(ks[7], (vocab,), jnp.float32) * 0.1,
    }
    # One-time weight prep (split / transpose / pad / cast) outside the hot path.
    params["joint_prepped"] = prepare_joint_weights(
        params["joint_w1"], params["joint_b1"],
        params["joint_w2"], params["joint_b2"],
        enc_dim=enc_dim, compute_dtype=jnp.bfloat16)

    U = U_t + 1
    Tp = _round_up(T, _T_TILE)
    Up = _round_up(U, _U_TILE)
    Vp = _round_up(vocab, _V_TILE)

    logits_padded = transducer_forward(params, inputs, targets)
    logits_padded = jax.block_until_ready(logits_padded)
    assert logits_padded.shape == (B, Tp, Up, Vp), logits_padded.shape

    # Trim padding for verification only (the hot path returns padded logits;
    # a real consumer masks instead of slicing).
    logits = logits_padded[:, :T, :U, :vocab]

    # Correctness vs. the plain-JAX f32 reference of the JointNet.
    enc_state = jnp.tanh(inputs @ params["w_enc"])
    dec_state = params["embedding"][jnp.pad(targets, ((0, 0), (1, 0)))]
    ref = joint_net_ref(enc_state, dec_state,
                        params["joint_w1"], params["joint_b1"],
                        params["joint_w2"], params["joint_b2"])

    # Padded vocab lanes must be exactly zero (zero-padded W2 columns / b2).
    assert float(jnp.max(jnp.abs(logits_padded[..., vocab:]))) == 0.0

    # bf16 matmul operands (f32 accumulation) -> loosened tolerance.
    err_bf16 = float(jnp.max(jnp.abs(logits - ref)))
    assert jnp.allclose(logits, ref, atol=5e-2, rtol=5e-2), err_bf16

    # f32 compute path should match the reference tightly.
    jw_f32 = prepare_joint_weights(
        params["joint_w1"], params["joint_b1"],
        params["joint_w2"], params["joint_b2"],
        enc_dim=enc_dim, compute_dtype=jnp.float32)
    logits_f32 = jax.block_until_ready(
        joint_net_pallas(enc_state, dec_state, jw_f32, out_dtype=jnp.float32))
    logits_f32 = logits_f32[:, :T, :U, :vocab]
    err_f32 = float(jnp.max(jnp.abs(logits_f32 - ref)))
    assert jnp.allclose(logits_f32, ref, atol=1e-4, rtol=1e-4), err_f32

    print("KERNEL_OK")
</pallas_src>

<mosaic_0001>
module attributes {stable_mosaic.version = 11 : i64} {
  func.func @_proj_kernel(%arg0: i32, %arg1: i32, %arg2: memref<1x64x64xbf16, #tpu.memory_space<vmem>>, %arg3: memref<64x128xbf16, #tpu.memory_space<vmem>>, %arg4: memref<1x128xf32, #tpu.memory_space<vmem>>, %arg5: memref<1x64x128xf32, #tpu.memory_space<vmem>>) attributes {dimension_semantics = [#tpu.dimension_semantics<parallel>, #tpu.dimension_semantics<parallel>], iteration_bounds = array<i64: 2, 1>, scalar_prefetch = 0 : i64, scratch_operands = 0 : i64, tpu.core_type = #tpu.core_type<tc>, window_params = [{transform_indices = @transform_0, window_bounds = array<i64: 1, 64, 64>}, {pipeline_mode = #tpu.pipeline_mode<synchronous>, transform_indices = @transform_1, window_bounds = array<i64: 64, 128>}, {pipeline_mode = #tpu.pipeline_mode<synchronous>, transform_indices = @transform_2, window_bounds = array<i64: 1, 128>}, {transform_indices = @transform_3, window_bounds = array<i64: 1, 64, 128>}]} {
    %c0 = arith.constant 0 : index
    %c0_0 = arith.constant 0 : index
    %c0_1 = arith.constant 0 : index
    %0 = vector.load %arg2[%c0, %c0_0, %c0_1] : memref<1x64x64xbf16, #tpu.memory_space<vmem>>, vector<1x64x64xbf16>
    %1 = vector.shape_cast %0 : vector<1x64x64xbf16> to vector<64x64xbf16>
    %c0_2 = arith.constant 0 : index
    %c0_3 = arith.constant 0 : index
    %2 = vector.load %arg3[%c0_2, %c0_3] : memref<64x128xbf16, #tpu.memory_space<vmem>>, vector<64x128xbf16>
    %cst = arith.constant dense<0.000000e+00> : vector<64x128xf32>
    %3 = tpu.matmul %1, %2, %cst {dimension_numbers = #tpu.dot_dimension_numbers<[1], [0], [0], [1], [0, 0, 1, 1], [], []>} : vector<64x64xbf16>, vector<64x128xbf16>, vector<64x128xf32> -> vector<64x128xf32>
    %c0_4 = arith.constant 0 : index
    %c0_5 = arith.constant 0 : index
    %4 = vector.load %arg4[%c0_4, %c0_5] : memref<1x128xf32, #tpu.memory_space<vmem>>, vector<1x128xf32>
    %5 = vector.broadcast %4 : vector<1x128xf32> to vector<64x128xf32>
    %6 = arith.addf %3, %5 : vector<64x128xf32>
    %c0_6 = arith.constant 0 : index
    %c0_7 = arith.constant 0 : index
    %c0_8 = arith.constant 0 : index
    %7 = vector.load %arg5[%c0_6, %c0_7, %c0_8] : memref<1x64x128xf32, #tpu.memory_space<vmem>>, vector<1x64x128xf32>
    %8 = vector.shape_cast %7 : vector<1x64x128xf32> to vector<64x128xf32>
    %9 = vector.shape_cast %6 : vector<64x128xf32> to vector<1x64x128xf32>
    tpu.vector_store %arg5[%c0_6, %c0_7, %c0_8], %9 {strides = array<i32>} : memref<1x64x128xf32, #tpu.memory_space<vmem>>, vector<1x64x128xf32>,
    return
  }
  func.func @transform_0(%arg0: i32, %arg1: i32) -> (i32, i32, i32) {
    %c0_i32 = arith.constant 0 : i32
    %c0_i32_0 = arith.constant 0 : i32
    return %arg0, %arg1, %c0_i32 : i32, i32, i32
  }
  func.func @transform_1(%arg0: i32, %arg1: i32) -> (i32, i32) {
    %c0_i32 = arith.constant 0 : i32
    %c0_i32_0 = arith.constant 0 : i32
    %c0_i32_1 = arith.constant 0 : i32
    return %c0_i32, %c0_i32_0 : i32, i32
  }
  func.func @transform_2(%arg0: i32, %arg1: i32) -> (i32, i32) {
    %c0_i32 = arith.constant 0 : i32
    %c0_i32_0 = arith.constant 0 : i32
    %c0_i32_1 = arith.constant 0 : i32
    return %c0_i32, %c0_i32_0 : i32, i32
  }
  func.func @transform_3(%arg0: i32, %arg1: i32) -> (i32, i32, i32) {
    %c0_i32 = arith.constant 0 : i32
    %c0_i32_0 = arith.constant 0 : i32
    return %arg0, %arg1, %c0_i32 : i32, i32, i32
  }
}

</mosaic_0001>

<bundles_post_ra>
// kernel: tpu_custom_call.1
= control target key start
LH: loop header
LB: loop body
LE: loop exit
PB: predicated region body
PF: predicated region fallthrough
CT: control target
= control target key end

     0   :  { %8 = vsyncpa [#allocation3], 0  ;;  %s1046_s0 = inlined_call_operand.hbm [shape: bf16[2,64,64], index: 0, kind: input, shape index: {}]   ;;  %s1047_s1 = inlined_call_operand.hbm [shape: bf16[64,128], index: 1, kind: input, shape index: {}]   ;;  %s1048_s2 = inlined_call_operand.vmem [shape: f32[1,128], index: 2, kind: input, shape index: {}]   ;;  %s1049_s3 = inlined_call_operand.hbm [shape: f32[2,64,128], index: 3, kind: output, shape index: {}]  }
   0x1   :  { %10 = vsyncpa [#allocation3 + $0x1], 0 }
   0x2   :  { %11 = vsyncpa [#allocation6], 0 }
   0x3   :  { %12 = vsyncpa [#allocation4], 0 }
   0x4   :  { %14 = vsyncpa [#allocation4 + $0x1], 0  ;;  %s813_s12 = smov 0   ;;  %s815_s13 = smov 0  }
   0x5   :  { %s817_s14 = smov 0   ;;  %s819_s15 = smov 0  }
   0x6   :  { %s821_s16 = smov 0   ;;  %s823_s17 = smov 0  }
   0x7 LB: > { %s491_s18 = sadd.s32 4294967295, %s784_s17   ;;  %s492_s19 = sadd.s32 4294967294, %s784_s17   ;;  %s784_s17 = sphi %s823_s17, %s20_s17   ;;  %s780_s16 = sphi %s821_s16, %s1073_s16   ;;  %s776_s15 = sphi %s819_s15, %s1072_s15   ;;  %s772_s14 = sphi %s817_s14, %s1071_s14   ;;  %s768_s13 = sphi %s815_s13, %s1070_s13   ;;  %s764_s12 = sphi %s813_s12, %s1069_s12  }
   0x8   : > { %p54_p0 = scmp.ne.s32.totalorder %s768_s13, %s764_s12  ;;  %p847_p1 = scmp.eq.s32.totalorder %s491_s18, 0 }
   0x9   : > { %p851_p2 = scmp.eq.s32.totalorder %s491_s18, 1  ;;  %p128_p3 = scmp.eq.s32.totalorder %s492_s19, 1 }
   0xa   : > { %s1054_s20 = scalar_select %p847_p1, 1, 0 }
   0xb   : > { %s1055_s21 = scalar_select %p851_p2, 1, 0 }
   0xc   : > { %p857_p4 = por %p847_p1, %p54_p0  ;;  %p493_p5 = scmp.ge.s32.totalorder %s784_s17, 1 }
   0xd   : > { %p862_p6 = por %p128_p3, %p54_p0  ;;  %p135_p7 = scmp.lt.s32.totalorder %s784_s17, 3 }
   0xe   : > { %s1056_s22 = scalar_select %p857_p4, 1, 0 }
   0xf   : > { %s1057_s23 = scalar_select %p862_p6, 1, 0 }
  0x10   : > { %p867_p8 = pnand %p493_p5, %p135_p7  ;;  %s786_s25 = smov [#allocation5]  }
  0x11   : > { %s147_s26 = sshll.u32 %s786_s25, 4  ;;  %s32_s28 = sadd.s32 1, %s780_s16  ;;  %s148_s26 = int_to_ptr.vmem [resolvable:$true] %s147_s26 }
  0x12   : > { %s1058_s24 = scalar_select %p867_p8, 1, 0 }
  0x13   : > { %p563_p9 = pneg %p867_p8  ;;  %s640_s4 = scalar_lea.hbm %s1047_s1, 512 }
  0x14   : > { %p641_p12 = scmp.ne.s32.totalorder %s1047_s1, %s640_s4  ;;  %p647_p5 = scmp.lt.u32.totalorder %s640_s4, %s1047_s1 }
  0x15   : > { %p876_p11 = pnand %p563_p9, %p847_p1 }
  0x17   : > { %p642_p13 = pneg %p876_p11 }
  0x19   : > { %p643_p0 = pnand %p642_p13, %p641_p12 }
  0x1b   : > { %p644_p3 = pneg %p643_p0 }
  0x1d   : > { %p649_p7 = pnand %p647_p5, %p644_p3 }
  0x1f   : > { %652 = shalt.err (!%p649_p7)
}
  0x20   : > { %s653_s9 = scalar_lea.vmem %s148_s26, 512  ;;  %p661_p1 = scmp.lt.s32.totalorder %s148_s26, %s148_s26 }
  0x21   : > { %p654_p9 = scmp.ne.s32.totalorder %s148_s26, %s653_s9  ;;  %p662_p4 = scmp.lt.s32.totalorder %s653_s9, %s653_s9 }
  0x23   : > { %p656_p10 = pnand %p654_p9, %p642_p13  ;;  %p663_p8 = por %p662_p4, %p661_p1 }
  0x25   : > { %p657_p6 = pneg %p656_p10 }
  0x27   : > { %p664_p2 = pnand %p663_p8, %p657_p6 }
  0x29   : > { %667 = shalt.err (!%p664_p2)
}
  0x2a   : > { %s787_s10 = smov 64   ;;  %s788_s11 = smov 4  }
  0x2b   : > { %566 = dma.hbm_to_vmem [thread:$0]  (!%p876_p11), %s1047_s1, 512, %s148_s26, [#allocation6], %s787_s10, %s787_s10, %s788_s11  }
  0x2c   : > { %p34_p1 = scmp.ge.s32.totalorder %s32_s28, 2  ;;  %s41_s25 = sadd.s32 1, %s772_s14 }
  0x2d   : > { %p48_p2 = scmp.ne.s32.totalorder %s772_s14, %s768_s13  ;;  %p49_p4 = scmp.eq.s32.totalorder %s784_s17, 0 }
  0x2e   : > { %s1075_s28 = smov (%p34_p1, %s32_s28), 0  ;;  %p1061_p8 = scmp.ne.s32.totalorder %s1055_s21, 0 }
  0x2f   : > { %p906_p6 = por %p49_p4, %p48_p2  ;;  %s36_s30 = ssub.s32 %s780_s16, %s1075_s28 }
  0x30   : > { %p912_p10 = por %p1061_p8, %p48_p2  ;;  %p576_p12 = scmp.lt.s32.totalorder %s784_s17, 2 }
  0x31   : > { %p39_p11 = scmp.eq.s32.totalorder %s36_s30, 0  ;;  %s164_s26 = sand.u32 1, %s772_s14  }
  0x32   : > { %s496_s4 = sshll.u32 %s164_s26, 5  ;;  %s521_s6 = sshll.u32 %s780_s16, 9 }
  0x33   : > { %s921_s5 = scalar_select %p39_p11, %s772_s14, %s41_s25  }
  0x34   : > { %s927_s9 = scalar_lea.hbm %s1046_s0, %s521_s6  ;;  %s168_s21 = scalar_lea.vmem [#allocation2], %s496_s4 }
  0x35   : > { %s177_s18 = sshll.u32 %s168_s21, 4  ;;  %p933_p13 = pnand %p576_p12, %p906_p6  ;;  %s929_s18 = int_to_ptr.vmem [resolvable:$true] %s177_s18 }
  0x36   : > { %s937_s25 = scalar_lea.sflag [#allocation3], %s164_s26  ;;  %s668_s30 = scalar_lea.hbm %s927_s9, 512 }
  0x37   : > { %p669_p0 = scmp.ne.s32.totalorder %s927_s9, %s668_s30  ;;  %p670_p3 = pneg %p933_p13 }
  0x38   : > { %s673_s29 = scalar_lea.hbm %s1046_s0, 1024  ;;  %p674_p9 = scmp.lt.u32.totalorder %s927_s9, %s1046_s0 }
  0x39   : > { %p671_p5 = pnand %p670_p3, %p669_p0  ;;  %p675_p1 = scmp.lt.u32.totalorder %s673_s29, %s668_s30 }
  0x3a   : > { %p677_p4 = scmp.lt.u32.totalorder %s668_s30, %s927_s9 }
  0x3b   : > { %p672_p7 = pneg %p671_p5  ;;  %p676_p2 = por %p675_p1, %p674_p9 }
  0x3d   : > { %p678_p6 = por %p677_p4, %p676_p2 }
  0x3f   : > { %p679_p8 = pnand %p678_p6, %p672_p7 }
  0x41   : > { %682 = shalt.err (!%p679_p8)
}
  0x42   : > { %s683_s26 = scalar_lea.vmem %s929_s18, 512  ;;  %s789_s21 = smov [#allocation2]  }
  0x43   : > { %p684_p12 = scmp.ne.s32.totalorder %s929_s18, %s683_s26  ;;  %s688_s4 = sshll.u32 %s789_s21, 4  ;;  %s689_s4 = int_to_ptr.vmem [resolvable:$false] %s688_s4 }
  0x44   : > { %s690_s6 = scalar_lea.vmem %s689_s4, 1024  ;;  %p691_p5 = scmp.lt.s32.totalorder %s929_s18, %s689_s4 }
  0x45   : > { %p686_p11 = pnand %p684_p12, %p670_p3  ;;  %p692_p9 = scmp.lt.s32.totalorder %s690_s6, %s683_s26 }
  0x47   : > { %p687_p0 = pneg %p686_p11  ;;  %p693_p1 = por %p692_p9, %p691_p5 }
  0x49   : > { %p694_p2 = pnand %p693_p1, %p687_p0 }
  0x4b   : > { %697 = shalt.err (!%p694_p2)
}
  0x4c   : > { %570 = dma.hbm_to_vmem [thread:$0]  (!%p933_p13), %s927_s9, 512, %s929_s18, %s937_s25, %s787_s10, %s787_s10, %s788_s11  }
  0x4d   : > { %p1064_p3 = scmp.ne.s32.totalorder %s1058_s24, 0 }
  0x4e   : > { %s971_s30 = sand.u32 (!%p1064_p3), 1, %s768_s13   ;;  %p1065_p7 = scmp.ne.s32.totalorder (!%p1064_p3), %s1056_s22, 0 }
  0x4f   : > { %189 = sbr.rel (%p1064_p3) target bundleno = 339 (0x153), region = 32  ;;  %s500_s29 = sshll.u32 (!%p1064_p3), %s971_s30, 5 }
  0x50   : > { %s192_s7 = scalar_lea.sflag (!%p1064_p3), [#allocation3], %s971_s30  ;;  %s195_s8 = scalar_lea.vmem (!%p1064_p3), [#allocation2], %s500_s29 }
  0x56   : > { %751 = dma.done.wait (%p1065_p7), %s192_s7, 512  }
  0x57   : > { %753 = vsyncadd (%p1065_p7), %s192_s7, 4294966784  ;;  %p1066_p4 = scmp.ne.s32.totalorder %s1054_s20, 0 }
  0x59   : > { %755 = dma.done.wait (%p1066_p4), [#allocation6], 512  }
  0x5a   : > { %757 = vsyncadd (%p1066_p4), [#allocation6], 4294966784  ;;  %v632_v0 = vld [vmem:[#allocation5] sm:$0xff]   ;;  %v633_v1 = vld [vmem:[#allocation5 + $0x8] sm:$0xff]   ;;  %vm292_vm0 = vcmask 523264   ;;  %s502_s20 = sshll.u32 %s971_s30, 6 }
  0x5b   : > { %531 = vmatprep.subr.bf16.mxu0 %v632_v0  ;;  %547 = vmatprep.subr.bf16.mxu1 %v632_v0  ;;  %v634_v2 = vld [vmem:[#allocation5 + $0x10] sm:$0xff]   ;;  %v636_v3 = vld [vmem:[%s195_s8] sm:$0xff]   ;;  %v635_v5 = vld [vmem:[#allocation5 + $0x18] sm:$0xff]   ;;  %s221_s10 = scalar_lea.vmem [#allocation7], %s502_s20  ;;  %s522_s9 = sshll.u32 %s776_s15, 10 }
  0x5c   : > { %532 = vmatpush3.bf16.msra.mxu0 %v632_v0  ;;  %551 = vmatpush3.bf16.msra.mxu1 %v632_v0  ;;  %v637_v4 = vld [vmem:[%s195_s8 + $0x10] sm:$0xff]   ;;  %v638_v6 = vld [vmem:[%s195_s8 + $0x8] sm:$0xff]   ;;  %v639_v7 = vld [vmem:[%s195_s8 + $0x18] sm:$0xff]   ;;  %s394_s11 = sshll.u32 %s221_s10, 4  ;;  %s997_s19 = scalar_lea.hbm %s1049_s3, %s522_s9  ;;  %s992_s11 = int_to_ptr.vmem [resolvable:$true] %s394_s11 }
  0x5d   : > { %533 = vmatprep.subr.bf16.mxu0 %v633_v1  ;;  %548 = vmatprep.subr.bf16.mxu1 %v633_v1  ;;  %v503_v8 = vld [vmem:[%s1048_s2] ss:$0 sm:$0xff]  ;;  %s379_s25 = scalar_lea.sflag [#allocation4], %s971_s30  ;;  %s698_s26 = scalar_lea.vmem %s992_s11, 1024 }
  0x5e   : > { %539 = vmatprep.mubr.msk.bf16.mxu0 %vm292_vm0, %v636_v3  ;;  %543 = vmatprep.mubr.msk.bf16.mxu1 %vm292_vm0, %v637_v4  ;;  %p699_p13 = scmp.ne.s32.totalorder %s992_s11, %s698_s26  ;;  %s790_s21 = smov [#allocation7]  }
  0x5f   : > { %s702_s4 = sshll.u32 %s790_s21, 4  ;;  %s703_s4 = int_to_ptr.vmem [resolvable:$false] %s702_s4 }
  0x60   : > { %534 = vmatpush3.bf16.msra.mxu0 %v633_v1  ;;  %552 = vmatpush3.bf16.msra.mxu1 %v633_v1  ;;  %p700_p6 = pnand %p699_p13, %p912_p10  ;;  %s704_s6 = scalar_lea.vmem %s703_s4, 2048 }
  0x61   : > { %535 = vmatprep.subr.bf16.mxu0 %v634_v2  ;;  %549 = vmatprep.subr.bf16.mxu1 %v634_v2  ;;  %p705_p12 = scmp.lt.s32.totalorder %s992_s11, %s703_s4  ;;  %p706_p11 = scmp.lt.s32.totalorder %s704_s6, %s698_s26 }
  0x62   : > { %p701_p8 = pneg %p700_p6 }
  0x63   : > { %p707_p0 = por %p706_p11, %p705_p12 }
  0x64   : > { %536 = vmatpush3.bf16.msra.mxu0 %v634_v2  ;;  %553 = vmatpush3.bf16.msra.mxu1 %v634_v2 }
  0x65   : > { %537 = vmatprep.subr.bf16.mxu0 %v635_v5  ;;  %550 = vmatprep.subr.bf16.mxu1 %v635_v5  ;;  %p708_p5 = pnand %p707_p0, %p701_p8 }
  0x68   : > { %538 = vmatpush3.bf16.msra.mxu0 %v635_v5  ;;  %554 = vmatpush3.bf16.msra.mxu1 %v635_v5 }
  0x6b   : > { %540 = vmatmul.mubr.msk.bf16.vlgmr.msra.gmra.mrb[0].mxu0 %vm292_vm0, %v638_v6  ;;  %544 = vmatmul.mubr.msk.bf16.vlgmr.msra.gmra.mrb[0].mxu1 %vm292_vm0, %v639_v7 }
 0x13e   : > { %v541_v9 = vpop.f32.mrb[0].mxu0  ;;  %v545_v10 = vpop.f32.mrb[0].mxu1 }
 0x13f   : > { %v348_v11 = vadd.f32 %v541_v9, %v503_v8  ;;  %v364_v12 = vadd.f32 %v545_v10, %v503_v8  ;;  %v339_v13 = vpop.f32.mrb[1].mxu0  ;;  %v355_v14 = vpop.f32.mrb[1].mxu1 }
 0x140   : > { %v340_v15 = vadd.f32 %v503_v8, %v339_v13  ;;  %v356_v16 = vadd.f32 %v503_v8, %v355_v14  ;;  %v542_v17 = vpop.f32.mrb[2].mxu0  ;;  %v546_v18 = vpop.f32.mrb[2].mxu1 }
 0x141   : > { %372 = vst [vmem:[%s221_s10 + $0x10] sm:$0xff] %v348_v11  ;;  %376 = vst [vmem:[%s221_s10 + $0x30] sm:$0xff] %v364_v12  ;;  %v351_v19 = vadd.f32 %v542_v17, %v503_v8  ;;  %v367_v20 = vadd.f32 %v546_v18, %v503_v8  ;;  %v342_v21 = vpop.f32.mrb[3].mxu0  ;;  %v358_v22 = vpop.f32.mrb[3].mxu1 }
 0x142   : > { %370 = vst [vmem:[%s221_s10] sm:$0xff] %v340_v15  ;;  %374 = vst [vmem:[%s221_s10 + $0x20] sm:$0xff] %v356_v16  ;;  %v343_v23 = vadd.f32 %v503_v8, %v342_v21  ;;  %v359_v24 = vadd.f32 %v503_v8, %v358_v22 }
 0x143   : > { %373 = vst [vmem:[%s221_s10 + $0x18] sm:$0xff] %v351_v19  ;;  %377 = vst [vmem:[%s221_s10 + $0x38] sm:$0xff] %v367_v20 }
 0x144   : > { %371 = vst [vmem:[%s221_s10 + $0x8] sm:$0xff] %v343_v23  ;;  %375 = vst [vmem:[%s221_s10 + $0x28] sm:$0xff] %v359_v24 }
 0x145   : > { %711 = shalt.err (!%p708_p5)
}
 0x146   : > { %s712_s29 = scalar_lea.hbm %s997_s19, 1024  ;;  %s716_s20 = scalar_lea.hbm %s1049_s3, 2048 }
 0x147   : > { %p713_p9 = scmp.ne.s32.totalorder %s997_s19, %s712_s29  ;;  %p717_p3 = scmp.lt.u32.totalorder %s997_s19, %s1049_s3 }
 0x148   : > { %p718_p7 = scmp.lt.u32.totalorder %s716_s20, %s712_s29  ;;  %p720_p13 = scmp.lt.u32.totalorder %s712_s29, %s997_s19 }
 0x149   : > { %p714_p1 = pnand %p713_p9, %p912_p10 }
 0x14a   : > { %p719_p4 = por %p718_p7, %p717_p3 }
 0x14b   : > { %p715_p2 = pneg %p714_p1 }
 0x14c   : > { %p721_p6 = por %p720_p13, %p719_p4 }
 0x14e   : > { %p722_p8 = pnand %p721_p6, %p715_p2 }
 0x150   : > { %725 = shalt.err (!%p722_p8)
}
 0x151   : > { %s791_s10 = smov 128   ;;  %s792_s9 = smov 8  }
 0x152   : > { %561 = dma.vmem_to_hbm [thread:$0]  (%p912_p10), %s992_s11, 1024, %s997_s19, %s379_s25, %s791_s10, %s791_s10, %s792_s9  }
 0x153 PF: > { %s409_s15 = sand.u32 1, %s764_s12   ;;  %p1067_p12 = scmp.ne.s32.totalorder %s1057_s23, 0 }
 0x154   : > { %p1068_p11 = scmp.ge.s32.totalorder %s784_s17, 2  ;;  %s410_s18 = scalar_lea.sflag [#allocation4], %s409_s15 }
 0x156   : > { %p572_p0 = pnand %p1068_p11, %p1067_p12 }
 0x158   : > { %759 = dma.done.wait (!%p572_p0), %s410_s18, 1024  }
 0x159   : > { %761 = vsyncadd (!%p572_p0), %s410_s18, 4294966272  ;;  %s20_s17 = sadd.s32 1, %s784_s17   ;;  %s1069_s12 = smov %s768_s13 }
 0x15a   : > { %p17_p5 = scmp.ge.s32.totalorder %s20_s17, 4   ;;  %s1070_s13 = smov %s772_s14 }
 0x15b   : > { %s1071_s14 = smov %s921_s5  ;;  %s1072_s15 = smov %s780_s16 }
 0x15c   : > { %s1073_s16 = smov %s1075_s28  ;;  %19 = sbr.rel (!%p17_p5) target bundleno = 7 (0x7), region = 81 }
 0x163   :  { %415 = vsyncpa [#allocation3], 1 }
 0x164   :  { %417 = vsyncpa [#allocation3 + $0x1], 1 }
 0x165   :  { %418 = vsyncpa [#allocation6], 1 }
 0x166   :  { %419 = vsyncpa [#allocation4], 1 }
 0x167   :  { %421 = vsyncpa [#allocation4 + $0x1], 1 }

</bundles_post_ra>
